<compile_context>
chip_gen: v7x
topology: tpu7x:2x2x1
jax: 0.10.0
libtpu: 0.0.40
codegen_flags: <defaults>
</compile_context>

<pallas_src>
import jax
import jax.numpy as jnp
from jax.experimental import pallas as pl
from jax.experimental.pallas import tpu as pltpu


def _round_up(n, m):
    return ((n + m - 1) // m) * m


# --------------------------------------------------------------------------
# Fused Pallas kernel: entire v_head forward for one batch tile
# --------------------------------------------------------------------------

def critic_fused_kernel(x_ref, w_in_ref, b_in_ref,
                        se_in_w_ref, se_in_b_ref,
                        se2_wz_ref, se2_bz_ref,
                        se2_wb_ref, se2_bb_ref,
                        w_mid_ref, b_mid_ref,
                        w_out_ref, b_out_ref,
                        v_ref):
    # x        : (TB, D_in)
    # w_in     : (D_in, F)            b_in    : (1, F)
    # se_in_w  : (nb, F, sq)          se_in_b : (nb, 1, sq)    # folded W1@W2@se1_w
    # se2_wz   : (nb, sq, F)          se2_bz  : (nb, 1, F)     # sigmoid-gate half of SE_fc2
    # se2_wb   : (nb, sq, F)          se2_bb  : (nb, 1, F)     # additive-bias half of SE_fc2
    # w_mid    : (F, F)               b_mid   : (1, F)
    # w_out    : (1, F) (row)         b_out   : (1, 1)
    # v        : (TB, 1)
    n_blocks = se_in_w_ref.shape[0]

    # Flatten -> Linear -> ReLU
    h = jnp.dot(x_ref[...], w_in_ref[...],
                preferred_element_type=jnp.float32) + b_in_ref[...]
    h = jnp.maximum(h, 0.0)

    # LinearBlocks (statically unrolled; n_blocks is a small compile-time const).
    # y = L2(L1(h)) feeds only SE_fc1, so the chain is pre-folded into se_in_w/b.
    for blk in range(n_blocks):
        s = jnp.dot(h, se_in_w_ref[blk],
                    preferred_element_type=jnp.float32) + se_in_b_ref[blk]
        s = jnp.maximum(s, 0.0)                                   # relu(SE_fc1(y))
        # gate half -> sigmoid immediately (never materialize the (TB, 2F) tensor)
        z = jax.nn.sigmoid(
            jnp.dot(s, se2_wz_ref[blk],
                    preferred_element_type=jnp.float32) + se2_bz_ref[blk])
        bb = jnp.dot(s, se2_wb_ref[blk],
                     preferred_element_type=jnp.float32) + se2_bb_ref[blk]
        # out = relu( input*sigmoid(w) + b + input )
        h = jnp.maximum(h * z + bb + h, 0.0)

    # Linear -> ReLU
    h = jnp.dot(h, w_mid_ref[...],
                preferred_element_type=jnp.float32) + b_mid_ref[...]
    h = jnp.maximum(h, 0.0)
    # Linear(fc, 1): N=1 matmul replaced by VPU multiply + lane reduction.
    v = jnp.sum(h * w_out_ref[...], axis=-1, keepdims=True) + b_out_ref[...]
    v_ref[...] = v.astype(v_ref.dtype)


# --------------------------------------------------------------------------
# Parameter folding (mathematically identical re-parameterization)
# --------------------------------------------------------------------------

def _fold_params(p):
    """Fold W1@W2@se1_w (+ biases) per block and split SE_fc2 into gate/bias halves."""
    F = p["w_in"].shape[1]
    w12 = jnp.einsum("bij,bjk->bik", p["blk_w1"], p["blk_w2"])           # (nb, F, F)
    se_in_w = jnp.einsum("bij,bjk->bik", w12, p["se1_w"])                # (nb, F, sq)
    b12 = jnp.einsum("bij,bjk->bik", p["blk_b1"], p["blk_w2"]) + p["blk_b2"]
    se_in_b = jnp.einsum("bij,bjk->bik", b12, p["se1_w"]) + p["se1_b"]   # (nb, 1, sq)
    return {
        "se_in_w": se_in_w, "se_in_b": se_in_b,
        "se2_wz": p["se2_w"][:, :, :F], "se2_bz": p["se2_b"][:, :, :F],
        "se2_wb": p["se2_w"][:, :, F:], "se2_bb": p["se2_b"][:, :, F:],
    }


# --------------------------------------------------------------------------
# Wrapper: flatten, sublane-align batch, single pallas_call over batch tiles
# --------------------------------------------------------------------------

def critic_forward(params, state, *, batch_tile=256):
    """state: (B, shape[0], shape[1]). Returns v: (B, 1).

    batch_tile: sweep 128 (v5e) / 256-512 (v6e, v7x). For production, hoist
    _fold_params outside the per-step jit if params are reused across calls.
    """
    B = state.shape[0]
    x = state.reshape(B, -1).astype(jnp.float32)          # nn.Flatten (row-major)
    D_in = x.shape[1]
    F = params["w_in"].shape[1]
    fp = _fold_params(params)
    n_blocks = fp["se_in_w"].shape[0]
    sq = fp["se_in_w"].shape[2]
    w_out_row = params["w_out"].reshape(1, F)              # (F,1) -> (1,F) row

    # Sublane-align only (<=7 pad rows; skipped when B % 8 == 0). No full pad to a
    # tile multiple: the trailing ragged tile is masked by Pallas and sliced off.
    B_al = _round_up(B, 8)
    if B_al != B:
        x = jnp.pad(x, ((0, B_al - B), (0, 0)))
    tb = min(batch_tile, B_al)
    grid = (pl.cdiv(B_al, tb),)

    def full(shape):
        # whole-array block with a constant index_map: DMA'd once, VMEM-resident
        nd = len(shape)
        return pl.BlockSpec(shape, lambda i, _nd=nd: (0,) * _nd)

    in_specs = [
        pl.BlockSpec((tb, D_in), lambda i: (i, 0)),
        full((D_in, F)), full((1, F)),
        full((n_blocks, F, sq)), full((n_blocks, 1, sq)),
        full((n_blocks, sq, F)), full((n_blocks, 1, F)),
        full((n_blocks, sq, F)), full((n_blocks, 1, F)),
        full((F, F)), full((1, F)),
        full((1, F)), full((1, 1)),
    ]

    v = pl.pallas_call(
        critic_fused_kernel,
        out_shape=jax.ShapeDtypeStruct((B_al, 1), jnp.float32),
        grid=grid,
        in_specs=in_specs,
        out_specs=pl.BlockSpec((tb, 1), lambda i: (i, 0)),
        compiler_params=pltpu.CompilerParams(
            # "parallel" lets the batch axis shard across v7x's 2 TensorCores;
            # no-op on v5e/v6e. Total VMEM footprint is a few MB, so the default
            # scoped limit is fine even on v5e (16 MiB) / v7x (32 MiB).
            dimension_semantics=("parallel",)),
    )(x, params["w_in"], params["b_in"],
      fp["se_in_w"], fp["se_in_b"],
      fp["se2_wz"], fp["se2_bz"], fp["se2_wb"], fp["se2_bb"],
      params["w_mid"], params["b_mid"], w_out_row, params["b_out"])
    return v[:B]


# --------------------------------------------------------------------------
# Parameters (weights stored as (in, out); transpose once if loading a PyTorch
# checkpoint, which stores nn.Linear weights as (out, in)).
# --------------------------------------------------------------------------

def init_params(key, shape, fc_dims=128, blocks=3):
    D_in = shape[0] * shape[1]
    sq = fc_dims // 4
    keys = iter(jax.random.split(key, 8))

    def dense(k, shp, fan_in):
        return (jax.random.normal(k, shp, jnp.float32)
                / jnp.sqrt(jnp.float32(fan_in)))

    return {
        "w_in": dense(next(keys), (D_in, fc_dims), D_in),
        "b_in": jnp.zeros((1, fc_dims), jnp.float32),
        "blk_w1": dense(next(keys), (blocks, fc_dims, fc_dims), fc_dims),
        "blk_b1": jnp.zeros((blocks, 1, fc_dims), jnp.float32),
        "blk_w2": dense(next(keys), (blocks, fc_dims, fc_dims), fc_dims),
        "blk_b2": jnp.zeros((blocks, 1, fc_dims), jnp.float32),
        "se1_w": dense(next(keys), (blocks, fc_dims, sq), fc_dims),
        "se1_b": jnp.zeros((blocks, 1, sq), jnp.float32),
        "se2_w": dense(next(keys), (blocks, sq, 2 * fc_dims), sq),
        "se2_b": jnp.zeros((blocks, 1, 2 * fc_dims), jnp.float32),
        "w_mid": dense(next(keys), (fc_dims, fc_dims), fc_dims),
        "b_mid": jnp.zeros((1, fc_dims), jnp.float32),
        "w_out": dense(next(keys), (fc_dims, 1), fc_dims),
        "b_out": jnp.zeros((1, 1), jnp.float32),
    }


# --------------------------------------------------------------------------
# Pure-JAX reference (unfolded; validates both semantics and the fold numerics)
# --------------------------------------------------------------------------

def critic_forward_ref(params, state):
    B = state.shape[0]
    F = params["w_in"].shape[1]
    h = state.reshape(B, -1).astype(jnp.float32)
    h = jnp.maximum(h @ params["w_in"] + params["b_in"], 0.0)
    for blk in range(params["blk_w1"].shape[0]):
        y = h @ params["blk_w1"][blk] + params["blk_b1"][blk]
        y = y @ params["blk_w2"][blk] + params["blk_b2"][blk]
        s = jnp.maximum(y @ params["se1_w"][blk] + params["se1_b"][blk], 0.0)
        wb = s @ params["se2_w"][blk] + params["se2_b"][blk]
        z = jax.nn.sigmoid(wb[:, :F])
        b = wb[:, F:]
        h = jnp.maximum(h * z + b + h, 0.0)
    h = jnp.maximum(h @ params["w_mid"] + params["b_mid"], 0.0)
    return h @ params["w_out"] + params["b_out"]


# --------------------------------------------------------------------------

if __name__ == "__main__":
    # Small shapes consistent with the module: shape=(rows, cols), state (B, rows, cols)
    B = 2
    shape = (4, 16)          # Flatten -> D_in = 64
    fc_dims, blocks = 128, 3

    key = jax.random.PRNGKey(0)
    k_params, k_x = jax.random.split(key)
    params = init_params(k_params, shape, fc_dims=fc_dims, blocks=blocks)
    state = jax.random.normal(k_x, (B,) + shape, jnp.float32)

    fwd = jax.jit(critic_forward)
    v = jax.block_until_ready(fwd(params, state))

    assert v.shape == (B, 1)
    assert bool(jnp.all(jnp.isfinite(v)))
    v_ref = critic_forward_ref(params, state)
    assert bool(jnp.allclose(v, v_ref, rtol=1e-4, atol=1e-4))
    print("KERNEL_OK")
</pallas_src>

<mosaic_0001>
module attributes {stable_mosaic.version = 11 : i64} {
  func.func @critic_fused_kernel(%arg0: i32, %arg1: memref<8x64xf32, #tpu.memory_space<vmem>>, %arg2: memref<64x128xf32, #tpu.memory_space<vmem>>, %arg3: memref<1x128xf32, #tpu.memory_space<vmem>>, %arg4: memref<3x128x32xf32, #tpu.memory_space<vmem>>, %arg5: memref<3x1x32xf32, #tpu.memory_space<vmem>>, %arg6: memref<3x32x128xf32, #tpu.memory_space<vmem>>, %arg7: memref<3x1x128xf32, #tpu.memory_space<vmem>>, %arg8: memref<3x32x128xf32, #tpu.memory_space<vmem>>, %arg9: memref<3x1x128xf32, #tpu.memory_space<vmem>>, %arg10: memref<128x128xf32, #tpu.memory_space<vmem>>, %arg11: memref<1x128xf32, #tpu.memory_space<vmem>>, %arg12: memref<1x128xf32, #tpu.memory_space<vmem>>, %arg13: memref<1x1xf32, #tpu.memory_space<vmem>>, %arg14: memref<8x1xf32, #tpu.memory_space<vmem>>) attributes {dimension_semantics = [#tpu.dimension_semantics<parallel>], iteration_bounds = array<i64: 1>, scalar_prefetch = 0 : i64, scratch_operands = 0 : i64, tpu.core_type = #tpu.core_type<tc>, window_params = [{transform_indices = @transform_0, window_bounds = array<i64: 8, 64>}, {pipeline_mode = #tpu.pipeline_mode<synchronous>, transform_indices = @transform_1, window_bounds = array<i64: 64, 128>}, {pipeline_mode = #tpu.pipeline_mode<synchronous>, transform_indices = @transform_2, window_bounds = array<i64: 1, 128>}, {pipeline_mode = #tpu.pipeline_mode<synchronous>, transform_indices = @transform_3, window_bounds = array<i64: 3, 128, 32>}, {pipeline_mode = #tpu.pipeline_mode<synchronous>, transform_indices = @transform_4, window_bounds = array<i64: 3, 1, 32>}, {pipeline_mode = #tpu.pipeline_mode<synchronous>, transform_indices = @transform_5, window_bounds = array<i64: 3, 32, 128>}, {pipeline_mode = #tpu.pipeline_mode<synchronous>, transform_indices = @transform_6, window_bounds = array<i64: 3, 1, 128>}, {pipeline_mode = #tpu.pipeline_mode<synchronous>, transform_indices = @transform_7, window_bounds = array<i64: 3, 32, 128>}, {pipeline_mode = #tpu.pipeline_mode<synchronous>, transform_indices = @transform_8, window_bounds = array<i64: 3, 1, 128>}, {pipeline_mode = #tpu.pipeline_mode<synchronous>, transform_indices = @transform_9, window_bounds = array<i64: 128, 128>}, {pipeline_mode = #tpu.pipeline_mode<synchronous>, transform_indices = @transform_10, window_bounds = array<i64: 1, 128>}, {pipeline_mode = #tpu.pipeline_mode<synchronous>, transform_indices = @transform_11, window_bounds = array<i64: 1, 128>}, {pipeline_mode = #tpu.pipeline_mode<synchronous>, transform_indices = @transform_12, window_bounds = array<i64: 1, 1>}, {transform_indices = @transform_13, window_bounds = array<i64: 8, 1>}]} {
    %c0 = arith.constant 0 : index
    %c0_0 = arith.constant 0 : index
    %0 = vector.load %arg1[%c0, %c0_0] : memref<8x64xf32, #tpu.memory_space<vmem>>, vector<8x64xf32>
    %c0_1 = arith.constant 0 : index
    %c0_2 = arith.constant 0 : index
    %1 = vector.load %arg2[%c0_1, %c0_2] : memref<64x128xf32, #tpu.memory_space<vmem>>, vector<64x128xf32>
    %cst = arith.constant dense<0.000000e+00> : vector<8x128xf32>
    %2 = tpu.matmul %0, %1, %cst {dimension_numbers = #tpu.dot_dimension_numbers<[1], [0], [0], [1], [0, 0, 1, 1], [], []>} : vector<8x64xf32>, vector<64x128xf32>, vector<8x128xf32> -> vector<8x128xf32>
    %c0_3 = arith.constant 0 : index
    %c0_4 = arith.constant 0 : index
    %3 = vector.load %arg3[%c0_3, %c0_4] : memref<1x128xf32, #tpu.memory_space<vmem>>, vector<1x128xf32>
    %4 = vector.broadcast %3 : vector<1x128xf32> to vector<8x128xf32>
    %5 = arith.addf %2, %4 : vector<8x128xf32>
    %cst_5 = arith.constant 0.000000e+00 : f32
    %6 = vector.broadcast %cst_5 : f32 to vector<8x128xf32>
    %7 = arith.maximumf %5, %6 : vector<8x128xf32>
    %c0_6 = arith.constant 0 : index
    %c0_7 = arith.constant 0 : index
    %c0_8 = arith.constant 0 : index
    %8 = vector.load %arg4[%c0_6, %c0_7, %c0_8] : memref<3x128x32xf32, #tpu.memory_space<vmem>>, vector<1x128x32xf32>
    %9 = vector.shape_cast %8 : vector<1x128x32xf32> to vector<128x32xf32>
    %cst_9 = arith.constant dense<0.000000e+00> : vector<8x32xf32>
    %10 = tpu.matmul %7, %9, %cst_9 {dimension_numbers = #tpu.dot_dimension_numbers<[1], [0], [0], [1], [0, 0, 1, 1], [], []>} : vector<8x128xf32>, vector<128x32xf32>, vector<8x32xf32> -> vector<8x32xf32>
    %c0_10 = arith.constant 0 : index
    %c0_11 = arith.constant 0 : index
    %c0_12 = arith.constant 0 : index
    %11 = vector.load %arg5[%c0_10, %c0_11, %c0_12] : memref<3x1x32xf32, #tpu.memory_space<vmem>>, vector<1x1x32xf32>
    %12 = vector.shape_cast %11 : vector<1x1x32xf32> to vector<1x32xf32>
    %13 = vector.broadcast %12 : vector<1x32xf32> to vector<8x32xf32>
    %14 = arith.addf %10, %13 : vector<8x32xf32>
    %cst_13 = arith.constant 0.000000e+00 : f32
    %15 = vector.broadcast %cst_13 : f32 to vector<8x32xf32>
    %16 = arith.maximumf %14, %15 : vector<8x32xf32>
    %c0_14 = arith.constant 0 : index
    %c0_15 = arith.constant 0 : index
    %c0_16 = arith.constant 0 : index
    %17 = vector.load %arg6[%c0_14, %c0_15, %c0_16] : memref<3x32x128xf32, #tpu.memory_space<vmem>>, vector<1x32x128xf32>
    %18 = vector.shape_cast %17 : vector<1x32x128xf32> to vector<32x128xf32>
    %cst_17 = arith.constant dense<0.000000e+00> : vector<8x128xf32>
    %19 = tpu.matmul %16, %18, %cst_17 {dimension_numbers = #tpu.dot_dimension_numbers<[1], [0], [0], [1], [0, 0, 1, 1], [], []>} : vector<8x32xf32>, vector<32x128xf32>, vector<8x128xf32> -> vector<8x128xf32>
    %c0_18 = arith.constant 0 : index
    %c0_19 = arith.constant 0 : index
    %c0_20 = arith.constant 0 : index
    %20 = vector.load %arg7[%c0_18, %c0_19, %c0_20] : memref<3x1x128xf32, #tpu.memory_space<vmem>>, vector<1x1x128xf32>
    %21 = vector.shape_cast %20 : vector<1x1x128xf32> to vector<1x128xf32>
    %22 = vector.broadcast %21 : vector<1x128xf32> to vector<8x128xf32>
    %23 = arith.addf %19, %22 : vector<8x128xf32>
    %24 = arith.negf %23 : vector<8x128xf32>
    %25 = math.exp %24 : vector<8x128xf32>
    %cst_21 = arith.constant 1.000000e+00 : f32
    %26 = vector.broadcast %cst_21 : f32 to vector<8x128xf32>
    %27 = arith.addf %26, %25 : vector<8x128xf32>
    %28 = arith.divf %26, %27 : vector<8x128xf32>
    %c0_22 = arith.constant 0 : index
    %c0_23 = arith.constant 0 : index
    %c0_24 = arith.constant 0 : index
    %29 = vector.load %arg8[%c0_22, %c0_23, %c0_24] : memref<3x32x128xf32, #tpu.memory_space<vmem>>, vector<1x32x128xf32>
    %30 = vector.shape_cast %29 : vector<1x32x128xf32> to vector<32x128xf32>
    %cst_25 = arith.constant dense<0.000000e+00> : vector<8x128xf32>
    %31 = tpu.matmul %16, %30, %cst_25 {dimension_numbers = #tpu.dot_dimension_numbers<[1], [0], [0], [1], [0, 0, 1, 1], [], []>} : vector<8x32xf32>, vector<32x128xf32>, vector<8x128xf32> -> vector<8x128xf32>
    %c0_26 = arith.constant 0 : index
    %c0_27 = arith.constant 0 : index
    %c0_28 = arith.constant 0 : index
    %32 = vector.load %arg9[%c0_26, %c0_27, %c0_28] : memref<3x1x128xf32, #tpu.memory_space<vmem>>, vector<1x1x128xf32>
    %33 = vector.shape_cast %32 : vector<1x1x128xf32> to vector<1x128xf32>
    %34 = vector.broadcast %33 : vector<1x128xf32> to vector<8x128xf32>
    %35 = arith.addf %31, %34 : vector<8x128xf32>
    %36 = arith.mulf %7, %28 : vector<8x128xf32>
    %37 = arith.addf %36, %35 : vector<8x128xf32>
    %38 = arith.addf %37, %7 : vector<8x128xf32>
    %cst_29 = arith.constant 0.000000e+00 : f32
    %39 = vector.broadcast %cst_29 : f32 to vector<8x128xf32>
    %40 = arith.maximumf %38, %39 : vector<8x128xf32>
    %c1 = arith.constant 1 : index
    %c0_30 = arith.constant 0 : index
    %c0_31 = arith.constant 0 : index
    %41 = vector.load %arg4[%c1, %c0_30, %c0_31] : memref<3x128x32xf32, #tpu.memory_space<vmem>>, vector<1x128x32xf32>
    %42 = vector.shape_cast %41 : vector<1x128x32xf32> to vector<128x32xf32>
    %cst_32 = arith.constant dense<0.000000e+00> : vector<8x32xf32>
    %43 = tpu.matmul %40, %42, %cst_32 {dimension_numbers = #tpu.dot_dimension_numbers<[1], [0], [0], [1], [0, 0, 1, 1], [], []>} : vector<8x128xf32>, vector<128x32xf32>, vector<8x32xf32> -> vector<8x32xf32>
    %c1_33 = arith.constant 1 : index
    %c0_34 = arith.constant 0 : index
    %c0_35 = arith.constant 0 : index
    %44 = vector.load %arg5[%c1_33, %c0_34, %c0_35] : memref<3x1x32xf32, #tpu.memory_space<vmem>>, vector<1x1x32xf32>
    %45 = vector.shape_cast %44 : vector<1x1x32xf32> to vector<1x32xf32>
    %46 = vector.broadcast %45 : vector<1x32xf32> to vector<8x32xf32>
    %47 = arith.addf %43, %46 : vector<8x32xf32>
    %cst_36 = arith.constant 0.000000e+00 : f32
    %48 = vector.broadcast %cst_36 : f32 to vector<8x32xf32>
    %49 = arith.maximumf %47, %48 : vector<8x32xf32>
    %c1_37 = arith.constant 1 : index
    %c0_38 = arith.constant 0 : index
    %c0_39 = arith.constant 0 : index
    %50 = vector.load %arg6[%c1_37, %c0_38, %c0_39] : memref<3x32x128xf32, #tpu.memory_space<vmem>>, vector<1x32x128xf32>
    %51 = vector.shape_cast %50 : vector<1x32x128xf32> to vector<32x128xf32>
    %cst_40 = arith.constant dense<0.000000e+00> : vector<8x128xf32>
    %52 = tpu.matmul %49, %51, %cst_40 {dimension_numbers = #tpu.dot_dimension_numbers<[1], [0], [0], [1], [0, 0, 1, 1], [], []>} : vector<8x32xf32>, vector<32x128xf32>, vector<8x128xf32> -> vector<8x128xf32>
    %c1_41 = arith.constant 1 : index
    %c0_42 = arith.constant 0 : index
    %c0_43 = arith.constant 0 : index
    %53 = vector.load %arg7[%c1_41, %c0_42, %c0_43] : memref<3x1x128xf32, #tpu.memory_space<vmem>>, vector<1x1x128xf32>
    %54 = vector.shape_cast %53 : vector<1x1x128xf32> to vector<1x128xf32>
    %55 = vector.broadcast %54 : vector<1x128xf32> to vector<8x128xf32>
    %56 = arith.addf %52, %55 : vector<8x128xf32>
    %57 = arith.negf %56 : vector<8x128xf32>
    %58 = math.exp %57 : vector<8x128xf32>
    %cst_44 = arith.constant 1.000000e+00 : f32
    %59 = vector.broadcast %cst_44 : f32 to vector<8x128xf32>
    %60 = arith.addf %59, %58 : vector<8x128xf32>
    %61 = arith.divf %59, %60 : vector<8x128xf32>
    %c1_45 = arith.constant 1 : index
    %c0_46 = arith.constant 0 : index
    %c0_47 = arith.constant 0 : index
    %62 = vector.load %arg8[%c1_45, %c0_46, %c0_47] : memref<3x32x128xf32, #tpu.memory_space<vmem>>, vector<1x32x128xf32>
    %63 = vector.shape_cast %62 : vector<1x32x128xf32> to vector<32x128xf32>
    %cst_48 = arith.constant dense<0.000000e+00> : vector<8x128xf32>
    %64 = tpu.matmul %49, %63, %cst_48 {dimension_numbers = #tpu.dot_dimension_numbers<[1], [0], [0], [1], [0, 0, 1, 1], [], []>} : vector<8x32xf32>, vector<32x128xf32>, vector<8x128xf32> -> vector<8x128xf32>
    %c1_49 = arith.constant 1 : index
    %c0_50 = arith.constant 0 : index
    %c0_51 = arith.constant 0 : index
    %65 = vector.load %arg9[%c1_49, %c0_50, %c0_51] : memref<3x1x128xf32, #tpu.memory_space<vmem>>, vector<1x1x128xf32>
    %66 = vector.shape_cast %65 : vector<1x1x128xf32> to vector<1x128xf32>
    %67 = vector.broadcast %66 : vector<1x128xf32> to vector<8x128xf32>
    %68 = arith.addf %64, %67 : vector<8x128xf32>
    %69 = arith.mulf %40, %61 : vector<8x128xf32>
    %70 = arith.addf %69, %68 : vector<8x128xf32>
    %71 = arith.addf %70, %40 : vector<8x128xf32>
    %cst_52 = arith.constant 0.000000e+00 : f32
    %72 = vector.broadcast %cst_52 : f32 to vector<8x128xf32>
    %73 = arith.maximumf %71, %72 : vector<8x128xf32>
    %c2 = arith.constant 2 : index
    %c0_53 = arith.constant 0 : index
    %c0_54 = arith.constant 0 : index
    %74 = vector.load %arg4[%c2, %c0_53, %c0_54] : memref<3x128x32xf32, #tpu.memory_space<vmem>>, vector<1x128x32xf32>
    %75 = vector.shape_cast %74 : vector<1x128x32xf32> to vector<128x32xf32>
    %cst_55 = arith.constant dense<0.000000e+00> : vector<8x32xf32>
    %76 = tpu.matmul %73, %75, %cst_55 {dimension_numbers = #tpu.dot_dimension_numbers<[1], [0], [0], [1], [0, 0, 1, 1], [], []>} : vector<8x128xf32>, vector<128x32xf32>, vector<8x32xf32> -> vector<8x32xf32>
    %c2_56 = arith.constant 2 : index
    %c0_57 = arith.constant 0 : index
    %c0_58 = arith.constant 0 : index
    %77 = vector.load %arg5[%c2_56, %c0_57, %c0_58] : memref<3x1x32xf32, #tpu.memory_space<vmem>>, vector<1x1x32xf32>
    %78 = vector.shape_cast %77 : vector<1x1x32xf32> to vector<1x32xf32>
    %79 = vector.broadcast %78 : vector<1x32xf32> to vector<8x32xf32>
    %80 = arith.addf %76, %79 : vector<8x32xf32>
    %cst_59 = arith.constant 0.000000e+00 : f32
    %81 = vector.broadcast %cst_59 : f32 to vector<8x32xf32>
    %82 = arith.maximumf %80, %81 : vector<8x32xf32>
    %c2_60 = arith.constant 2 : index
    %c0_61 = arith.constant 0 : index
    %c0_62 = arith.constant 0 : index
    %83 = vector.load %arg6[%c2_60, %c0_61, %c0_62] : memref<3x32x128xf32, #tpu.memory_space<vmem>>, vector<1x32x128xf32>
    %84 = vector.shape_cast %83 : vector<1x32x128xf32> to vector<32x128xf32>
    %cst_63 = arith.constant dense<0.000000e+00> : vector<8x128xf32>
    %85 = tpu.matmul %82, %84, %cst_63 {dimension_numbers = #tpu.dot_dimension_numbers<[1], [0], [0], [1], [0, 0, 1, 1], [], []>} : vector<8x32xf32>, vector<32x128xf32>, vector<8x128xf32> -> vector<8x128xf32>
    %c2_64 = arith.constant 2 : index
    %c0_65 = arith.constant 0 : index
    %c0_66 = arith.constant 0 : index
    %86 = vector.load %arg7[%c2_64, %c0_65, %c0_66] : memref<3x1x128xf32, #tpu.memory_space<vmem>>, vector<1x1x128xf32>
    %87 = vector.shape_cast %86 : vector<1x1x128xf32> to vector<1x128xf32>
    %88 = vector.broadcast %87 : vector<1x128xf32> to vector<8x128xf32>
    %89 = arith.addf %85, %88 : vector<8x128xf32>
    %90 = arith.negf %89 : vector<8x128xf32>
    %91 = math.exp %90 : vector<8x128xf32>
    %cst_67 = arith.constant 1.000000e+00 : f32
    %92 = vector.broadcast %cst_67 : f32 to vector<8x128xf32>
    %93 = arith.addf %92, %91 : vector<8x128xf32>
    %94 = arith.divf %92, %93 : vector<8x128xf32>
    %c2_68 = arith.constant 2 : index
    %c0_69 = arith.constant 0 : index
    %c0_70 = arith.constant 0 : index
    %95 = vector.load %arg8[%c2_68, %c0_69, %c0_70] : memref<3x32x128xf32, #tpu.memory_space<vmem>>, vector<1x32x128xf32>
    %96 = vector.shape_cast %95 : vector<1x32x128xf32> to vector<32x128xf32>
    %cst_71 = arith.constant dense<0.000000e+00> : vector<8x128xf32>
    %97 = tpu.matmul %82, %96, %cst_71 {dimension_numbers = #tpu.dot_dimension_numbers<[1], [0], [0], [1], [0, 0, 1, 1], [], []>} : vector<8x32xf32>, vector<32x128xf32>, vector<8x128xf32> -> vector<8x128xf32>
    %c2_72 = arith.constant 2 : index
    %c0_73 = arith.constant 0 : index
    %c0_74 = arith.constant 0 : index
    %98 = vector.load %arg9[%c2_72, %c0_73, %c0_74] : memref<3x1x128xf32, #tpu.memory_space<vmem>>, vector<1x1x128xf32>
    %99 = vector.shape_cast %98 : vector<1x1x128xf32> to vector<1x128xf32>
    %100 = vector.broadcast %99 : vector<1x128xf32> to vector<8x128xf32>
    %101 = arith.addf %97, %100 : vector<8x128xf32>
    %102 = arith.mulf %73, %94 : vector<8x128xf32>
    %103 = arith.addf %102, %101 : vector<8x128xf32>
    %104 = arith.addf %103, %73 : vector<8x128xf32>
    %cst_75 = arith.constant 0.000000e+00 : f32
    %105 = vector.broadcast %cst_75 : f32 to vector<8x128xf32>
    %106 = arith.maximumf %104, %105 : vector<8x128xf32>
    %c0_76 = arith.constant 0 : index
    %c0_77 = arith.constant 0 : index
    %107 = vector.load %arg10[%c0_76, %c0_77] : memref<128x128xf32, #tpu.memory_space<vmem>>, vector<128x128xf32>
    %cst_78 = arith.constant dense<0.000000e+00> : vector<8x128xf32>
    %108 = tpu.matmul %106, %107, %cst_78 {dimension_numbers = #tpu.dot_dimension_numbers<[1], [0], [0], [1], [0, 0, 1, 1], [], []>} : vector<8x128xf32>, vector<128x128xf32>, vector<8x128xf32> -> vector<8x128xf32>
    %c0_79 = arith.constant 0 : index
    %c0_80 = arith.constant 0 : index
    %109 = vector.load %arg11[%c0_79, %c0_80] : memref<1x128xf32, #tpu.memory_space<vmem>>, vector<1x128xf32>
    %110 = vector.broadcast %109 : vector<1x128xf32> to vector<8x128xf32>
    %111 = arith.addf %108, %110 : vector<8x128xf32>
    %cst_81 = arith.constant 0.000000e+00 : f32
    %112 = vector.broadcast %cst_81 : f32 to vector<8x128xf32>
    %113 = arith.maximumf %111, %112 : vector<8x128xf32>
    %c0_82 = arith.constant 0 : index
    %c0_83 = arith.constant 0 : index
    %114 = vector.load %arg12[%c0_82, %c0_83] : memref<1x128xf32, #tpu.memory_space<vmem>>, vector<1x128xf32>
    %115 = vector.broadcast %114 : vector<1x128xf32> to vector<8x128xf32>
    %116 = arith.mulf %113, %115 : vector<8x128xf32>
    %cst_84 = arith.constant dense<0.000000e+00> : vector<8xf32>
    %117 = vector.multi_reduction <add>, %116, %cst_84 [1] : vector<8x128xf32> to vector<8xf32>
    %118 = vector.shape_cast %117 : vector<8xf32> to vector<8x1xf32>
    %c0_85 = arith.constant 0 : index
    %c0_86 = arith.constant 0 : index
    %119 = vector.load %arg13[%c0_85, %c0_86] : memref<1x1xf32, #tpu.memory_space<vmem>>, vector<1x1xf32>
    %120 = vector.broadcast %119 : vector<1x1xf32> to vector<8x1xf32>
    %121 = arith.addf %118, %120 : vector<8x1xf32>
    %c0_87 = arith.constant 0 : index
    %c0_88 = arith.constant 0 : index
    %122 = vector.load %arg14[%c0_87, %c0_88] : memref<8x1xf32, #tpu.memory_space<vmem>>, vector<8x1xf32>
    tpu.vector_store %arg14[%c0_87, %c0_88], %121 {strides = array<i32>} : memref<8x1xf32, #tpu.memory_space<vmem>>, vector<8x1xf32>,
    return
  }
  func.func @transform_0(%arg0: i32) -> (i32, i32) {
    %c0_i32 = arith.constant 0 : i32
    %c0_i32_0 = arith.constant 0 : i32
    return %arg0, %c0_i32 : i32, i32
  }
  func.func @transform_1(%arg0: i32) -> (i32, i32) {
    %c0_i32 = arith.constant 0 : i32
    %c0_i32_0 = arith.constant 0 : i32
    %c0_i32_1 = arith.constant 0 : i32
    return %c0_i32, %c0_i32_0 : i32, i32
  }
  func.func @transform_2(%arg0: i32) -> (i32, i32) {
    %c0_i32 = arith.constant 0 : i32
    %c0_i32_0 = arith.constant 0 : i32
    %c0_i32_1 = arith.constant 0 : i32
    return %c0_i32, %c0_i32_0 : i32, i32
  }
  func.func @transform_3(%arg0: i32) -> (i32, i32, i32) {
    %c0_i32 = arith.constant 0 : i32
    %c0_i32_0 = arith.constant 0 : i32
    %c0_i32_1 = arith.constant 0 : i32
    %c0_i32_2 = arith.constant 0 : i32
    return %c0_i32, %c0_i32_0, %c0_i32_1 : i32, i32, i32
  }
  func.func @transform_4(%arg0: i32) -> (i32, i32, i32) {
    %c0_i32 = arith.constant 0 : i32
    %c0_i32_0 = arith.constant 0 : i32
    %c0_i32_1 = arith.constant 0 : i32
    %c0_i32_2 = arith.constant 0 : i32
    return %c0_i32, %c0_i32_0, %c0_i32_1 : i32, i32, i32
  }
  func.func @transform_5(%arg0: i32) -> (i32, i32, i32) {
    %c0_i32 = arith.constant 0 : i32
    %c0_i32_0 = arith.constant 0 : i32
    %c0_i32_1 = arith.constant 0 : i32
    %c0_i32_2 = arith.constant 0 : i32
    return %c0_i32, %c0_i32_0, %c0_i32_1 : i32, i32, i32
  }
  func.func @transform_6(%arg0: i32) -> (i32, i32, i32) {
    %c0_i32 = arith.constant 0 : i32
    %c0_i32_0 = arith.constant 0 : i32
    %c0_i32_1 = arith.constant 0 : i32
    %c0_i32_2 = arith.constant 0 : i32
    return %c0_i32, %c0_i32_0, %c0_i32_1 : i32, i32, i32
  }
  func.func @transform_7(%arg0: i32) -> (i32, i32, i32) {
    %c0_i32 = arith.constant 0 : i32
    %c0_i32_0 = arith.constant 0 : i32
    %c0_i32_1 = arith.constant 0 : i32
    %c0_i32_2 = arith.constant 0 : i32
    return %c0_i32, %c0_i32_0, %c0_i32_1 : i32, i32, i32
  }
  func.func @transform_8(%arg0: i32) -> (i32, i32, i32) {
    %c0_i32 = arith.constant 0 : i32
    %c0_i32_0 = arith.constant 0 : i32
    %c0_i32_1 = arith.constant 0 : i32
    %c0_i32_2 = arith.constant 0 : i32
    return %c0_i32, %c0_i32_0, %c0_i32_1 : i32, i32, i32
  }
  func.func @transform_9(%arg0: i32) -> (i32, i32) {
    %c0_i32 = arith.constant 0 : i32
    %c0_i32_0 = arith.constant 0 : i32
    %c0_i32_1 = arith.constant 0 : i32
    return %c0_i32, %c0_i32_0 : i32, i32
  }
  func.func @transform_10(%arg0: i32) -> (i32, i32) {
    %c0_i32 = arith.constant 0 : i32
    %c0_i32_0 = arith.constant 0 : i32
    %c0_i32_1 = arith.constant 0 : i32
    return %c0_i32, %c0_i32_0 : i32, i32
  }
  func.func @transform_11(%arg0: i32) -> (i32, i32) {
    %c0_i32 = arith.constant 0 : i32
    %c0_i32_0 = arith.constant 0 : i32
    %c0_i32_1 = arith.constant 0 : i32
    return %c0_i32, %c0_i32_0 : i32, i32
  }
  func.func @transform_12(%arg0: i32) -> (i32, i32) {
    %c0_i32 = arith.constant 0 : i32
    %c0_i32_0 = arith.constant 0 : i32
    %c0_i32_1 = arith.constant 0 : i32
    return %c0_i32, %c0_i32_0 : i32, i32
  }
  func.func @transform_13(%arg0: i32) -> (i32, i32) {
    %c0_i32 = arith.constant 0 : i32
    %c0_i32_0 = arith.constant 0 : i32
    return %arg0, %c0_i32 : i32, i32
  }
}

</mosaic_0001>

<bundles_post_ra>
// kernel: critic_forward.1
= control target key start
LH: loop header
LB: loop body
LE: loop exit
PB: predicated region body
PF: predicated region fallthrough
CT: control target
= control target key end

     0   :  { %v1643_v0 = vmov 0.0|0.0   ;;  %vm1644_vm0 = vmmov 0   ;;  %v1645_v4 = vmov 0.0   ;;  %vm62_vm1 = vcmask 523264   ;;  %s2140_s1 = inlined_call_operand.vmem [shape: f32[64,128], index: 1, kind: input, shape index: {}]   ;;  %s2141_s3 = inlined_call_operand.vmem [shape: f32[3,128,32], index: 3, kind: input, shape index: {}]   ;;  %s2142_s0 = inlined_call_operand.vmem [shape: f32[8,64], index: 0, kind: input, shape index: {}]   ;;  %s2143_s5 = inlined_call_operand.vmem [shape: f32[3,32,128], index: 5, kind: input, shape index: {}]   ;;  %s2144_s2 = inlined_call_operand.vmem [shape: f32[1,128], index: 2, kind: input, shape index: {}]   ;;  %s2145_s4 = inlined_call_operand.vmem [shape: f32[3,1,32], index: 4, kind: input, shape index: {}]   ;;  %s2146_s7 = inlined_call_operand.vmem [shape: f32[3,32,128], index: 7, kind: input, shape index: {}]   ;;  %s2147_s6 = inlined_call_operand.vmem [shape: f32[3,1,128], index: 6, kind: input, shape index: {}]   ;;  %s2148_s8 = inlined_call_operand.vmem [shape: f32[3,1,128], index: 8, kind: input, shape index: {}]   ;;  %s2149_s9 = inlined_call_operand.vmem [shape: f32[128,128], index: 9, kind: input, shape index: {}]   ;;  %s2150_s12 = inlined_call_operand.<no memory space> [shape: f32[1,1], index: 12, kind: input, shape index: {}]   ;;  %s2151_s10 = inlined_call_operand.vmem [shape: f32[1,128], index: 10, kind: input, shape index: {}]   ;;  %s2152_s11 = inlined_call_operand.vmem [shape: f32[1,128], index: 11, kind: input, shape index: {}]   ;;  %s2153_s13 = inlined_call_operand.vmem [shape: f32[8,1], index: 13, kind: output, shape index: {}]  }
   0x1   :  { %1484 = vmatprep.subr.bf16.mxu1 %v1643_v0  ;;  %v47_v1 = vld [vmem:[%s2140_s1] sm:$0xff]  ;;  %v48_v2 = vld [vmem:[%s2140_s1 + $0x8] sm:$0xff]  ;;  %v49_v3 = vld [vmem:[%s2140_s1 + $0x10] sm:$0xff]  ;;  %1275 = vmatprep.mubr.msk.f32.mxu1 %vm1644_vm0, %v1645_v4  ;;  %vm242_vm2 = vcmask 261120   ;;  %vm1069_vm3 = vcmask 7168  }
   0x2   :  { %v1485_v5 = vpack.c.bf16 %v48_v2, %v47_v1  ;;  %v50_v6 = vld [vmem:[%s2140_s1 + $0x18] sm:$0xff]  ;;  %1520 = vmatprep.subr.bf16.mxu0 %v1643_v0  ;;  %1321 = vmatprep.mubr.msk.f32.mxu0 %vm1644_vm0, %v1645_v4  ;;  %v51_v8 = vld [vmem:[%s2140_s1 + $0x20] sm:$0xff]  ;;  %v52_v9 = vld [vmem:[%s2140_s1 + $0x28] sm:$0xff] }
   0x3   :  { %v1488_v7 = vpack.c.bf16 %v50_v6, %v49_v3  ;;  %v1491_v10 = vpack.c.bf16 %v52_v9, %v51_v8  ;;  %v53_v11 = vld [vmem:[%s2140_s1 + $0x30] sm:$0xff]  ;;  %v54_v12 = vld [vmem:[%s2140_s1 + $0x38] sm:$0xff]  ;;  %v137_v14 = vld [vmem:[%s2141_s3] sm:$0xff] }
   0x4   :  { %1486 = vmatpush3.bf16.msra.mxu1 %v1485_v5  ;;  %v1494_v13 = vpack.c.bf16 %v54_v12, %v53_v11  ;;  %v138_v15 = vld [vmem:[%s2141_s3 + $0x8] sm:$0xff]  ;;  %v46_v16 = vld [vmem:[%s2142_s0] sm:$0xff]  ;;  %v139_v18 = vld [vmem:[%s2141_s3 + $0x10] sm:$0xff] }
   0x5   :  { %1487 = vmatprep.subr.bf16.mxu1 %v1643_v0  ;;  %v1497_v17 = vpack.c.bf16 %v138_v15, %v137_v14  ;;  %v140_v19 = vld [vmem:[%s2141_s3 + $0x18] sm:$0xff]  ;;  %v141_v21 = vld [vmem:[%s2141_s3 + $0x20] sm:$0xff]  ;;  %v142_v22 = vld [vmem:[%s2141_s3 + $0x28] sm:$0xff] }
   0x6   :  { %v1500_v20 = vpack.c.bf16 %v140_v19, %v139_v18  ;;  %v1503_v23 = vpack.c.bf16 %v142_v22, %v141_v21  ;;  %v143_v24 = vld [vmem:[%s2141_s3 + $0x30] sm:$0xff]  ;;  %v144_v25 = vld [vmem:[%s2141_s3 + $0x38] sm:$0xff]  ;;  %v145_v27 = vld [vmem:[%s2141_s3 + $0x40] sm:$0xff] }
   0x7   :  { %v1506_v26 = vpack.c.bf16 %v144_v25, %v143_v24  ;;  %v146_v28 = vld [vmem:[%s2141_s3 + $0x48] sm:$0xff]  ;;  %v147_v30 = vld [vmem:[%s2141_s3 + $0x50] sm:$0xff]  ;;  %v148_v31 = vld [vmem:[%s2141_s3 + $0x58] sm:$0xff] }
   0x8   :  { %1489 = vmatpush3.bf16.msra.mxu1 %v1488_v7  ;;  %v1509_v29 = vpack.c.bf16 %v146_v28, %v145_v27  ;;  %v1512_v32 = vpack.c.bf16 %v148_v31, %v147_v30  ;;  %v149_v33 = vld [vmem:[%s2141_s3 + $0x60] sm:$0xff]  ;;  %v150_v34 = vld [vmem:[%s2141_s3 + $0x68] sm:$0xff]  ;;  %v151_v36 = vld [vmem:[%s2141_s3 + $0x70] sm:$0xff] }
   0x9   :  { %1490 = vmatprep.subr.bf16.mxu1 %v1643_v0  ;;  %v1515_v35 = vpack.c.bf16 %v150_v34, %v149_v33  ;;  %v152_v37 = vld [vmem:[%s2141_s3 + $0x78] sm:$0xff]  ;;  %v231_v39 = vld [vmem:[%s2143_s5] sm:$0xff]  ;;  %v232_v40 = vld [vmem:[%s2143_s5 + $0x8] sm:$0xff] }
   0xa   :  { %v1518_v38 = vpack.c.bf16 %v152_v37, %v151_v36  ;;  %v1521_v41 = vpack.c.bf16 %v232_v40, %v231_v39  ;;  %v1075_v42 = vld [vmem:[%s2144_s2] ss:$0 sm:$0xff]  ;;  %v233_v47 = vld [vmem:[%s2143_s5 + $0x10] sm:$0xff]  ;;  %v234_v48 = vld [vmem:[%s2143_s5 + $0x18] sm:$0xff] }
   0xb   :  { %v1524_v49 = vpack.c.bf16 %v234_v48, %v233_v47  ;;  %v1077_v50 = vld [vmem:[%s2145_s4] ss:$0 sm:$0xff]  ;;  %v323_v52 = vld [vmem:[%s2146_s7 + $0x8] sm:$0xff]  ;;  %v324_v58 = vld [vmem:[%s2146_s7 + $0x10] sm:$0xff] }
   0xc   :  { %1492 = vmatpush3.bf16.msra.mxu1 %v1491_v10  ;;  %1522 = vmatpush3.bf16.msra.mxu0 %v1521_v41  ;;  %v322_v51 = vld [vmem:[%s2146_s7] sm:$0xff]  ;;  %v325_v59 = vld [vmem:[%s2146_s7 + $0x18] sm:$0xff]  ;;  %v1084_v62 = vld [vmem:[%s2141_s3 + $0x88] sm:$0xff] }
   0xd   :  { %1493 = vmatprep.subr.bf16.mxu1 %v1643_v0  ;;  %1523 = vmatprep.subr.bf16.mxu0 %v1643_v0  ;;  %v1527_v56 = vpack.c.bf16 %v323_v52, %v322_v51  ;;  %v1530_v60 = vpack.c.bf16 %v325_v59, %v324_v58  ;;  %v1083_v61 = vld [vmem:[%s2141_s3 + $0x80] sm:$0xff]  ;;  %v1085_v1 = vld [vmem:[%s2141_s3 + $0x90] sm:$0xff]  ;;  %v1086_v2 = vld [vmem:[%s2141_s3 + $0x98] sm:$0xff] }
   0xe   :  { %v1533_v63 = vpack.c.bf16 %v1084_v62, %v1083_v61  ;;  %v1536_v3 = vpack.c.bf16 %v1086_v2, %v1085_v1  ;;  %v1087_v5 = vld [vmem:[%s2141_s3 + $0xa0] sm:$0xff]  ;;  %v1088_v6 = vld [vmem:[%s2141_s3 + $0xa8] sm:$0xff]  ;;  %v1089_v8 = vld [vmem:[%s2141_s3 + $0xb0] sm:$0xff] }
   0xf   :  { %v1539_v7 = vpack.c.bf16 %v1088_v6, %v1087_v5  ;;  %v1090_v9 = vld [vmem:[%s2141_s3 + $0xb8] sm:$0xff]  ;;  %v1091_v11 = vld [vmem:[%s2141_s3 + $0xc0] sm:$0xff]  ;;  %v1092_v12 = vld [vmem:[%s2141_s3 + $0xc8] sm:$0xff] }
  0x10   :  { %1495 = vmatpush3.bf16.msra.mxu1 %v1494_v13  ;;  %1525 = vmatpush3.bf16.msra.mxu0 %v1524_v49  ;;  %v1542_v10 = vpack.c.bf16 %v1090_v9, %v1089_v8  ;;  %v1545_v13 = vpack.c.bf16 %v1092_v12, %v1091_v11  ;;  %v1093_v14 = vld [vmem:[%s2141_s3 + $0xd0] sm:$0xff]  ;;  %v1094_v15 = vld [vmem:[%s2141_s3 + $0xd8] sm:$0xff]  ;;  %v1096_v18 = vld [vmem:[%s2141_s3 + $0xe8] sm:$0xff] }
  0x11   :  { %1496 = vmatprep.subr.bf16.mxu1 %v1643_v0  ;;  %1526 = vmatprep.subr.bf16.mxu0 %v1643_v0  ;;  %v1098_v21 = vld [vmem:[%s2141_s3 + $0xf8] sm:$0xff]  ;;  %v1102_v24 = vld [vmem:[%s2143_s5 + $0x28] sm:$0xff]  ;;  %v1118_v59 = vld [vmem:[%s2141_s3 + $0x110] sm:$0xff] }
  0x12   :  { %v1110_v47 = vld [vmem:[%s2146_s7 + $0x28] sm:$0xff]  ;;  %v1120_v62 = vld [vmem:[%s2141_s3 + $0x120] sm:$0xff]  ;;  %v1122_v2 = vld [vmem:[%s2141_s3 + $0x130] sm:$0xff] }
  0x13   :  { %1276 = vmatmul.mubr.msk.f32.vlgmr.msra.gmra.mrb[0].mxu1 %vm62_vm1, %v46_v16  ;;  %v1548_v16 = vpack.c.bf16 %v1094_v15, %v1093_v14  ;;  %v1124_v6 = vld [vmem:[%s2141_s3 + $0x140] sm:$0xff]  ;;  %v1126_v9 = vld [vmem:[%s2141_s3 + $0x150] sm:$0xff] }
  0x14   :  { %1498 = vmatpush3.bf16.msra.mxu1 %v1497_v17  ;;  %1310 = vmatprep.mubr.msk.f32.mxu1 %vm1644_vm0, %v1645_v4  ;;  %v1095_v17 = vld [vmem:[%s2141_s3 + $0xe0] sm:$0xff]  ;;  %v1130_v15 = vld [vmem:[%s2141_s3 + $0x170] sm:$0xff] }
  0x15   :  { %1499 = vmatprep.subr.bf16.mxu1 %v1643_v0  ;;  %v1551_v19 = vpack.c.bf16 %v1096_v18, %v1095_v17  ;;  %v1128_v12 = vld [vmem:[%s2141_s3 + $0x160] sm:$0xff] }
  0x16   :  { %v1134_v18 = vld [vmem:[%s2143_s5 + $0x40] sm:$0xff] }
  0x18   :  { %1501 = vmatpush3.bf16.msra.mxu1 %v1500_v20  ;;  %v1097_v20 = vld [vmem:[%s2141_s3 + $0xf0] sm:$0xff] }
  0x19   :  { %1502 = vmatprep.subr.bf16.mxu1 %v1643_v0  ;;  %v1554_v22 = vpack.c.bf16 %v1098_v21, %v1097_v20  ;;  %v1106_v21 = vld [vmem:[%s2147_s6 + $0x1] ss:$0 sm:$0xff] }
  0x1c   :  { %1504 = vmatpush3.bf16.msra.mxu1 %v1503_v23  ;;  %v1101_v23 = vld [vmem:[%s2143_s5 + $0x20] sm:$0xff] }
  0x1d   :  { %1505 = vmatprep.subr.bf16.mxu1 %v1643_v0  ;;  %v1557_v25 = vpack.c.bf16 %v1102_v24, %v1101_v23 }
  0x20   :  { %1507 = vmatpush3.bf16.msra.mxu1 %v1506_v26  ;;  %v1078_v26 = vld [vmem:[%s2147_s6] ss:$0 sm:$0xff] }
  0x21   :  { %1508 = vmatprep.subr.bf16.mxu1 %v1643_v0 }
  0x24   :  { %1510 = vmatpush3.bf16.msra.mxu1 %v1509_v29 }
  0x25   :  { %1511 = vmatprep.subr.bf16.mxu1 %v1643_v0 }
  0x28   :  { %1513 = vmatpush3.bf16.msra.mxu1 %v1512_v32 }
  0x29   :  { %1514 = vmatprep.subr.bf16.mxu1 %v1643_v0 }
  0x2c   :  { %1516 = vmatpush3.bf16.msra.mxu1 %v1515_v35  ;;  %v1081_v35 = vld [vmem:[%s2148_s8] ss:$0 sm:$0xff] }
  0x2d   :  { %1517 = vmatprep.subr.bf16.mxu1 %v1643_v0 }
  0x30   :  { %1519 = vmatpush3.bf16.msra.mxu1 %v1518_v38 }
  0x31   :  { %1556 = vmatprep.subr.bf16.mxu1 %v1643_v0 }
  0xe6   :  { %v132_v43 = vpop.f32.mrb[0].mxu1 }
  0xe7   :  { %v133_v44 = vadd.f32 %v1075_v42, %v132_v43  ;;  %v1277_v45 = vpop.f32.mrb[1].mxu1  ;;  %v1103_v42 = vld [vmem:[%s2143_s5 + $0x30] sm:$0xff]  ;;  %v1104_v43 = vld [vmem:[%s2143_s5 + $0x38] sm:$0xff] }
  0xe8   :  { %v1100_v45 = vld [vmem:[%s2145_s4 + $0x1] ss:$0 sm:$0xff] }
  0xe9   :  { %v1821_v46 = vmax.f32 %v133_v44, 0.0  ;;  %v1560_v44 = vpack.c.bf16 %v1104_v43, %v1103_v42  ;;  %v1143_v42 = vld [vmem:[%s2146_s7 + $0x48] sm:$0xff] }
  0xeb   :  { %1311 = vmatmul.mubr.f32.vlgmr.msra.gmra.mrb[2].mxu1 %v1821_v46 }
  0xec   :  { %1378 = vmatprep.mubr.msk.f32.mxu1 %vm1644_vm0, %v1645_v4  ;;  %1558 = vmatpush3.bf16.msra.mxu1 %v1557_v25 }
  0xed   :  { %1559 = vmatprep.subr.bf16.mxu1 %v1643_v0 }
  0xf0   :  { %1561 = vmatpush3.bf16.msra.mxu1 %v1560_v44 }
  0xf1   :  { %1562 = vmatprep.subr.bf16.mxu1 %v1643_v0 }
 0x1be   :  { %v226_v53 = vpop.f32.mrb[2].mxu1 }
 0x1bf   :  { %v227_v54 = vadd.f32 %v1077_v50, %v226_v53  ;;  %v1312_v55 = vpop.f32.mrb[3].mxu1  ;;  %v1111_v53 = vld [vmem:[%s2146_s7 + $0x30] sm:$0xff] }
 0x1c1   :  { %v230_v57 = vmax.f32 %v227_v54, 0.0  ;;  %v1112_v54 = vld [vmem:[%s2146_s7 + $0x38] sm:$0xff] }
 0x1c2   :  { %v1566_v55 = vpack.c.bf16 %v1112_v54, %v1111_v53  ;;  %v959_v54 = vld [vmem:[%s2149_s9 + $0x10] sm:$0xff] }
 0x1c3   :  { %1322 = vmatmul.mubr.msk.f32.vlgmr.msra.gmra.mrb[0].mxu0 %vm242_vm2, %v230_v57 }
 0x1c4   :  { %1528 = vmatpush3.bf16.msra.mxu0 %v1527_v56  ;;  %1332 = vmatprep.mubr.msk.f32.mxu0 %vm1644_vm0, %v1645_v4  ;;  %v1116_v56 = vld [vmem:[%s2141_s3 + $0x100] sm:$0xff] }
 0x1c5   :  { %1529 = vmatprep.subr.bf16.mxu0 %v1643_v0 }
 0x1c8   :  { %1531 = vmatpush3.bf16.msra.mxu0 %v1530_v60  ;;  %v1119_v60 = vld [vmem:[%s2141_s3 + $0x118] sm:$0xff] }
 0x1c9   :  { %1532 = vmatprep.subr.bf16.mxu0 %v1643_v0  ;;  %v1572_v61 = vpack.c.bf16 %v1119_v60, %v1118_v59  ;;  %v963_v59 = vld [vmem:[%s2149_s9 + $0x30] sm:$0xff]  ;;  %v964_v60 = vld [vmem:[%s2149_s9 + $0x38] sm:$0xff] }
 0x1cb   :  { %1333 = vmatmul.mubr.msk.f32.vlgmr.msra.gmra.mrb[2].mxu0 %vm242_vm2, %v230_v57  ;;  %v1117_v57 = vld [vmem:[%s2141_s3 + $0x108] sm:$0xff] }
 0x1cc   :  { %1367 = vmatprep.mubr.msk.f32.mxu0 %vm1644_vm0, %v1645_v4  ;;  %1534 = vmatpush3.bf16.msra.mxu0 %v1533_v63  ;;  %v1569_v58 = vpack.c.bf16 %v1117_v57, %v1116_v56  ;;  %v1121_v63 = vld [vmem:[%s2141_s3 + $0x128] sm:$0xff]  ;;  %v961_v56 = vld [vmem:[%s2149_s9 + $0x20] sm:$0xff] }
 0x1cd   :  { %1535 = vmatprep.subr.bf16.mxu0 %v1643_v0  ;;  %v1575_v1 = vpack.c.bf16 %v1121_v63, %v1120_v62  ;;  %v962_v57 = vld [vmem:[%s2149_s9 + $0x28] sm:$0xff]  ;;  %v965_v62 = vld [vmem:[%s2149_s9 + $0x40] sm:$0xff] }
 0x1ce   :  { %v966_v63 = vld [vmem:[%s2149_s9 + $0x48] sm:$0xff] }
 0x1d0   :  { %1537 = vmatpush3.bf16.msra.mxu0 %v1536_v3  ;;  %v1123_v3 = vld [vmem:[%s2141_s3 + $0x138] sm:$0xff] }
 0x1d1   :  { %1538 = vmatprep.subr.bf16.mxu0 %v1643_v0  ;;  %v1578_v5 = vpack.c.bf16 %v1123_v3, %v1122_v2  ;;  %v967_v2 = vld [vmem:[%s2149_s9 + $0x50] sm:$0xff]  ;;  %v968_v3 = vld [vmem:[%s2149_s9 + $0x58] sm:$0xff] }
 0x1d4   :  { %1540 = vmatpush3.bf16.msra.mxu0 %v1539_v7  ;;  %v1125_v7 = vld [vmem:[%s2141_s3 + $0x148] sm:$0xff] }
 0x1d5   :  { %1541 = vmatprep.subr.bf16.mxu0 %v1643_v0  ;;  %v1581_v8 = vpack.c.bf16 %v1125_v7, %v1124_v6  ;;  %v969_v6 = vld [vmem:[%s2149_s9 + $0x60] sm:$0xff]  ;;  %v970_v7 = vld [vmem:[%s2149_s9 + $0x68] sm:$0xff] }
 0x1d8   :  { %1543 = vmatpush3.bf16.msra.mxu0 %v1542_v10  ;;  %v1127_v10 = vld [vmem:[%s2141_s3 + $0x158] sm:$0xff] }
 0x1d9   :  { %1544 = vmatprep.subr.bf16.mxu0 %v1643_v0  ;;  %v1584_v11 = vpack.c.bf16 %v1127_v10, %v1126_v9  ;;  %v971_v9 = vld [vmem:[%s2149_s9 + $0x70] sm:$0xff]  ;;  %v972_v10 = vld [vmem:[%s2149_s9 + $0x78] sm:$0xff] }
 0x1dc   :  { %1546 = vmatpush3.bf16.msra.mxu0 %v1545_v13  ;;  %v1129_v13 = vld [vmem:[%s2141_s3 + $0x168] sm:$0xff] }
 0x1dd   :  { %1547 = vmatprep.subr.bf16.mxu0 %v1643_v0  ;;  %v1587_v14 = vpack.c.bf16 %v1129_v13, %v1128_v12  ;;  %v1139_v12 = vld [vmem:[%s2147_s6 + $0x2] ss:$0 sm:$0xff] }
 0x1e0   :  { %1549 = vmatpush3.bf16.msra.mxu0 %v1548_v16  ;;  %v1131_v16 = vld [vmem:[%s2141_s3 + $0x178] sm:$0xff] }
 0x1e1   :  { %1550 = vmatprep.subr.bf16.mxu0 %v1643_v0  ;;  %v1590_v17 = vpack.c.bf16 %v1131_v16, %v1130_v15 }
 0x1e4   :  { %1552 = vmatpush3.bf16.msra.mxu0 %v1551_v19  ;;  %v1135_v19 = vld [vmem:[%s2143_s5 + $0x48] sm:$0xff] }
 0x1e5   :  { %1553 = vmatprep.subr.bf16.mxu0 %v1643_v0  ;;  %v1593_v20 = vpack.c.bf16 %v1135_v19, %v1134_v18 }
 0x1e8   :  { %1555 = vmatpush3.bf16.msra.mxu0 %v1554_v22 }
 0x1e9   :  { %1592 = vmatprep.subr.bf16.mxu0 %v1643_v0 }
 0x296   :  { %v312_v27 = vpop.f32.mrb[0].mxu0 }
 0x297   :  { %v313_v28 = vadd.f32 %v1078_v26, %v312_v27  ;;  %v1323_v29 = vpop.f32.mrb[1].mxu0 }
 0x299   :  { %v1080_v30 = vmul.f32 -1.442695, %v313_v28 }
 0x29b   :  { %1631 = vpow2.f32 %v1080_v30  ;;  %v1114_v30 = vld [vmem:[%s2148_s8 + $0x1] ss:$0 sm:$0xff] }
 0x29e   :  { %v399_v31 = vpop.f32.mrb[2].mxu0 }
 0x29f   :  { %v1334_v32 = vpop.f32.mrb[3].mxu0  ;;  %v400_v37 = vadd.f32 %v1081_v35, %v399_v31 }
 0x2a5   :  { %v1632_v33 = vpop.eup %1631 }
 0x2a6   :  { %v319_v34 = vadd.f32 1.0, %v1632_v33 }
 0x2a8   :  { %1633 = vrcp.f32 %v319_v34 }
 0x2b2   :  { %v1634_v36 = vpop.eup %1633 }
 0x2b3   :  { %v403_v38 = vmul.f32 %v1634_v36, %v1821_v46 }
 0x2b5   :  { %v404_v39 = vadd.f32 %v403_v38, %v400_v37  ;;  %v1136_v37 = vld [vmem:[%s2143_s5 + $0x50] sm:$0xff]  ;;  %v1137_v38 = vld [vmem:[%s2143_s5 + $0x58] sm:$0xff] }
 0x2b7   :  { %v405_v40 = vadd.f32 %v404_v39, %v1821_v46  ;;  %v1109_v46 = vld [vmem:[%s2146_s7 + $0x20] sm:$0xff]  ;;  %v1596_v39 = vpack.c.bf16 %v1137_v38, %v1136_v37 }
 0x2b8   :  { %v1563_v51 = vpack.c.bf16 %v1110_v47, %v1109_v46 }
 0x2b9   :  { %v1927_v41 = vmax.f32 %v405_v40, 0.0  ;;  %v1133_v40 = vld [vmem:[%s2145_s4 + $0x2] ss:$0 sm:$0xff] }
 0x2bb   :  { %1368 = vmatmul.mubr.f32.vlgmr.msra.gmra.mrb[4].mxu0 %v1927_v41 }
 0x2bc   :  { %1435 = vmatprep.mubr.msk.f32.mxu0 %vm1644_vm0, %v1645_v4  ;;  %1594 = vmatpush3.bf16.msra.mxu0 %v1593_v20  ;;  %v1147_v20 = vld [vmem:[%s2148_s8 + $0x2] ss:$0 sm:$0xff] }
 0x2bd   :  { %1595 = vmatprep.subr.bf16.mxu0 %v1643_v0 }
 0x2c0   :  { %1597 = vmatpush3.bf16.msra.mxu0 %v1596_v39 }
 0x2c1   :  { %1598 = vmatprep.subr.bf16.mxu0 %v1643_v0 }
 0x38e   :  { %v498_v48 = vpop.f32.mrb[4].mxu0 }
 0x38f   :  { %v499_v49 = vadd.f32 %v1100_v45, %v498_v48  ;;  %v1369_v50 = vpop.f32.mrb[5].mxu0  ;;  %v1144_v48 = vld [vmem:[%s2146_s7 + $0x50] sm:$0xff] }
 0x391   :  { %v502_v52 = vmax.f32 %v499_v49, 0.0  ;;  %v1145_v49 = vld [vmem:[%s2146_s7 + $0x58] sm:$0xff] }
 0x392   :  { %v1602_v50 = vpack.c.bf16 %v1145_v49, %v1144_v48 }
 0x393   :  { %1379 = vmatmul.mubr.msk.f32.vlgmr.msra.gmra.mrb[4].mxu1 %vm242_vm2, %v502_v52 }
 0x394   :  { %1564 = vmatpush3.bf16.msra.mxu1 %v1563_v51  ;;  %1389 = vmatprep.mubr.msk.f32.mxu1 %vm1644_vm0, %v1645_v4  ;;  %v957_v51 = vld [vmem:[%s2149_s9] sm:$0xff] }
 0x395   :  { %1565 = vmatprep.subr.bf16.mxu1 %v1643_v0 }
 0x398   :  { %1567 = vmatpush3.bf16.msra.mxu1 %v1566_v55 }
 0x399   :  { %1568 = vmatprep.subr.bf16.mxu1 %v1643_v0 }
 0x39b   :  { %1390 = vmatmul.mubr.msk.f32.vlgmr.msra.gmra.mrb[6].mxu1 %vm242_vm2, %v502_v52  ;;  %v958_v52 = vld [vmem:[%s2149_s9 + $0x8] sm:$0xff] }
 0x39c   :  { %1424 = vmatprep.mubr.msk.f32.mxu1 %vm1644_vm0, %v1645_v4  ;;  %1570 = vmatpush3.bf16.msra.mxu1 %v1569_v58  ;;  %v1605_v53 = vpack.c.bf16 %v958_v52, %v957_v51  ;;  %v1611_v58 = vpack.c.bf16 %v962_v57, %v961_v56 }
 0x39d   :  { %1571 = vmatprep.subr.bf16.mxu1 %v1643_v0 }
 0x3a0   :  { %1573 = vmatpush3.bf16.msra.mxu1 %v1572_v61  ;;  %v1614_v61 = vpack.c.bf16 %v964_v60, %v963_v59 }
 0x3a1   :  { %1574 = vmatprep.subr.bf16.mxu1 %v1643_v0 }
 0x3a4   :  { %1576 = vmatpush3.bf16.msra.mxu1 %v1575_v1  ;;  %v1617_v1 = vpack.c.bf16 %v966_v63, %v965_v62 }
 0x3a5   :  { %1577 = vmatprep.subr.bf16.mxu1 %v1643_v0 }
 0x3a8   :  { %1579 = vmatpush3.bf16.msra.mxu1 %v1578_v5  ;;  %v1620_v5 = vpack.c.bf16 %v968_v3, %v967_v2 }
 0x3a9   :  { %1580 = vmatprep.subr.bf16.mxu1 %v1643_v0 }
 0x3ac   :  { %1582 = vmatpush3.bf16.msra.mxu1 %v1581_v8  ;;  %v1623_v8 = vpack.c.bf16 %v970_v7, %v969_v6 }
 0x3ad   :  { %1583 = vmatprep.subr.bf16.mxu1 %v1643_v0 }
 0x3b0   :  { %1585 = vmatpush3.bf16.msra.mxu1 %v1584_v11  ;;  %v1626_v11 = vpack.c.bf16 %v972_v10, %v971_v9 }
 0x3b1   :  { %1586 = vmatprep.subr.bf16.mxu1 %v1643_v0 }
 0x3b4   :  { %1588 = vmatpush3.bf16.msra.mxu1 %v1587_v14 }
 0x3b5   :  { %1589 = vmatprep.subr.bf16.mxu1 %v1643_v0 }
 0x3b8   :  { %1591 = vmatpush3.bf16.msra.mxu1 %v1590_v17 }
 0x466   :  { %v585_v22 = vpop.f32.mrb[4].mxu1 }
 0x467   :  { %v586_v23 = vadd.f32 %v1106_v21, %v585_v22  ;;  %v1380_v24 = vpop.f32.mrb[5].mxu1 }
 0x469   :  { %v1108_v25 = vmul.f32 -1.442695, %v586_v23 }
 0x46b   :  { %1635 = vpow2.f32 %v1108_v25 }
 0x46e   :  { %v674_v26 = vpop.f32.mrb[6].mxu1 }
 0x46f   :  { %v1391_v27 = vpop.f32.mrb[7].mxu1  ;;  %v675_v32 = vadd.f32 %v1114_v30, %v674_v26 }
 0x470   :  { %v18_v27 = vstv %s2150_s12 }
 0x471   :  { %19 = vst [vmem:[#allocation2] sm:$0x1] %v18_v27 }
 0x475   :  { %v1636_v28 = vpop.eup %1635 }
 0x476   :  { %v592_v29 = vadd.f32 1.0, %v1636_v28  ;;  %v1149_v28 = vld [vmem:[%s2151_s10] ss:$0 sm:$0xff] }
 0x478   :  { %1637 = vrcp.f32 %v592_v29 }
 0x482   :  { %v1638_v31 = vpop.eup %1637 }
 0x483   :  { %v678_v33 = vmul.f32 %v1638_v31, %v1927_v41 }
 0x485   :  { %v679_v34 = vadd.f32 %v678_v33, %v675_v32  ;;  %v1150_v32 = vld [vmem:[%s2152_s11] ss:$0 sm:$0xff] }
 0x487   :  { %v680_v35 = vadd.f32 %v679_v34, %v1927_v41  ;;  %v1142_v41 = vld [vmem:[%s2146_s7 + $0x40] sm:$0xff] }
 0x488   :  { %v1599_v46 = vpack.c.bf16 %v1143_v42, %v1142_v41 }
 0x489   :  { %v2032_v36 = vmax.f32 %v680_v35, 0.0  ;;  %v1151_v35 = vld [vmem:[#allocation2] ss:$0 sm:$0xff] }
 0x48b   :  { %1425 = vmatmul.mubr.f32.vlgmr.msra.gmra.mrb[8].mxu1 %v2032_v36 }
 0x55e   :  { %v773_v43 = vpop.f32.mrb[8].mxu1 }
 0x55f   :  { %v774_v44 = vadd.f32 %v1133_v40, %v773_v43  ;;  %v1426_v45 = vpop.f32.mrb[9].mxu1 }
 0x561   :  { %v777_v47 = vmax.f32 %v774_v44, 0.0 }
 0x563   :  { %1436 = vmatmul.mubr.msk.f32.vlgmr.msra.gmra.mrb[6].mxu0 %vm242_vm2, %v777_v47 }
 0x564   :  { %1600 = vmatpush3.bf16.msra.mxu0 %v1599_v46  ;;  %1446 = vmatprep.mubr.msk.f32.mxu0 %vm1644_vm0, %v1645_v4 }
 0x565   :  { %1601 = vmatprep.subr.bf16.mxu0 %v1643_v0 }
 0x568   :  { %1603 = vmatpush3.bf16.msra.mxu0 %v1602_v50 }
 0x569   :  { %1604 = vmatprep.subr.bf16.mxu0 %v1643_v0 }
 0x56b   :  { %1447 = vmatmul.mubr.msk.f32.vlgmr.msra.gmra.mrb[8].mxu0 %vm242_vm2, %v777_v47 }
 0x56c   :  { %1481 = vmatprep.mubr.msk.f32.mxu0 %vm1644_vm0, %v1645_v4  ;;  %1606 = vmatpush3.bf16.msra.mxu0 %v1605_v53  ;;  %v960_v4 = vld [vmem:[%s2149_s9 + $0x18] sm:$0xff] }
 0x56d   :  { %1607 = vmatprep.subr.bf16.mxu0 %v1643_v0  ;;  %v1608_v55 = vpack.c.bf16 %v960_v4, %v959_v54 }
 0x570   :  { %1609 = vmatpush3.bf16.msra.mxu0 %v1608_v55 }
 0x571   :  { %1610 = vmatprep.subr.bf16.mxu0 %v1643_v0 }
 0x574   :  { %1612 = vmatpush3.bf16.msra.mxu0 %v1611_v58 }
 0x575   :  { %1613 = vmatprep.subr.bf16.mxu0 %v1643_v0 }
 0x578   :  { %1615 = vmatpush3.bf16.msra.mxu0 %v1614_v61 }
 0x579   :  { %1616 = vmatprep.subr.bf16.mxu0 %v1643_v0 }
 0x57c   :  { %1618 = vmatpush3.bf16.msra.mxu0 %v1617_v1 }
 0x57d   :  { %1619 = vmatprep.subr.bf16.mxu0 %v1643_v0 }
 0x580   :  { %1621 = vmatpush3.bf16.msra.mxu0 %v1620_v5 }
 0x581   :  { %1622 = vmatprep.subr.bf16.mxu0 %v1643_v0 }
 0x584   :  { %1624 = vmatpush3.bf16.msra.mxu0 %v1623_v8 }
 0x585   :  { %1625 = vmatprep.subr.bf16.mxu0 %v1643_v0 }
 0x588   :  { %1627 = vmatpush3.bf16.msra.mxu0 %v1626_v11 }
 0x636   :  { %v860_v13 = vpop.f32.mrb[6].mxu0 }
 0x637   :  { %v861_v14 = vadd.f32 %v1139_v12, %v860_v13  ;;  %v1437_v15 = vpop.f32.mrb[7].mxu0 }
 0x639   :  { %v1141_v16 = vmul.f32 -1.442695, %v861_v14 }
 0x63b   :  { %1639 = vpow2.f32 %v1141_v16 }
 0x63e   :  { %v949_v0 = vpop.f32.mrb[8].mxu0 }
 0x63f   :  { %v1448_v17 = vpop.f32.mrb[9].mxu0  ;;  %v950_v22 = vadd.f32 %v1147_v20, %v949_v0 }
 0x645   :  { %v1640_v18 = vpop.eup %1639 }
 0x646   :  { %v867_v19 = vadd.f32 1.0, %v1640_v18 }
 0x648   :  { %1641 = vrcp.f32 %v867_v19 }
 0x652   :  { %v1642_v21 = vpop.eup %1641 }
 0x653   :  { %v953_v23 = vmul.f32 %v1642_v21, %v2032_v36 }
 0x655   :  { %v954_v24 = vadd.f32 %v953_v23, %v950_v22 }
 0x657   :  { %v955_v25 = vadd.f32 %v954_v24, %v2032_v36 }
 0x659   :  { %v956_v26 = vmax.f32 %v955_v25, 0.0 }
 0x65b   :  { %1482 = vmatmul.mubr.f32.vlgmr.msra.gmra.mrb[10].mxu0 %v956_v26 }
 0x72e   :  { %v1046_v29 = vpop.f32.mrb[10].mxu0 }
 0x72f   :  { %v1047_v30 = vadd.f32 %v1149_v28, %v1046_v29  ;;  %v1483_v31 = vpop.f32.mrb[11].mxu0 }
 0x731   :  { %v1050_v33 = vmax.f32 %v1047_v30, 0.0 }
 0x733   :  { %v1058_v34 = vmul.f32 %v1150_v32, %v1050_v33 }
 0x735   :  { %1059 = vadd.xlane.f32.xlu0 %v1058_v34 }
 0x7c2   :  { %v1060_v36 = vpop.xlane.xlu0 %1059 }
 0x7c3   :  { %v1068_v37 = vadd.f32 %v1151_v35, %v1060_v36 }
 0x7c5   :  { %1070 = vst.msk [vmem:[%s2153_s13] sm:$0xff] %vm1069_vm3, %v1068_v37 }

</bundles_post_ra>
